<compile_context>
chip_gen: v6e
topology: v6e:2x2x1
jax: 0.10.0
libtpu: 0.0.40
codegen_flags: <defaults>
</compile_context>

<pallas_src>
import jax
import jax.numpy as jnp
from jax.experimental import pallas as pl
from jax.experimental.pallas import tpu as pltpu


def _soft_jaccard_kernel(logits_ref, tgt_ref, partial_ref):
    eps = 1e-07
    logits = logits_ref[...].astype(jnp.float32)
    targets = tgt_ref[...].astype(jnp.float32)

    probs = jax.nn.sigmoid(logits)                                   # EUP + VPU
    prod = probs * targets                                           # VPU
    inter = jnp.sum(prod, axis=1, keepdims=True)                     # (TB, 1) XLU
    union = jnp.sum(probs + targets - prod, axis=1, keepdims=True)   # (TB, 1)
    per_sample = 1.0 - (inter + eps) / (union + eps)                 # (TB, 1)

    tile_sum = jnp.sum(per_sample)      # padded rows contribute exactly 0
    # Lane-dense, unmasked store; each grid step owns its own output block so
    # the grid axis stays "parallel" (no cross-step accumulator).
    partial_ref[...] = jnp.full(partial_ref.shape, tile_sum,
                                dtype=partial_ref.dtype)


def soft_jaccard_loss(outputs: jax.Array, targets: jax.Array,
                      *, block_rows: int | None = None) -> jax.Array:
    """outputs, targets: (B, C) logits / binary labels. Returns scalar f32 loss."""
    assert outputs.shape == targets.shape and outputs.ndim == 2
    B, C = outputs.shape

    LANES = 128
    itemsize = max(jnp.dtype(outputs.dtype).itemsize,
                   jnp.dtype(targets.dtype).itemsize)
    sub = max(8, 32 // itemsize)          # sublane multiple: 8 (f32), 16 (bf16)

    c_pad = ((C + LANES - 1) // LANES) * LANES

    # Batch-tile height: largest multiple of `sub` such that
    # 2 inputs x 2 pipeline buffers x tb x c_pad x itemsize <= 32 MiB, capped
    # at 1024 rows (measured: >=512-row tiles already sit near HBM roofline).
    budget = 32 * 1024 * 1024
    max_tb = max(sub, (budget // (2 * 2 * c_pad * itemsize)) // sub * sub)
    b_round = ((B + sub - 1) // sub) * sub
    tb = block_rows if block_rows is not None else min(max_tb, b_round, 1024)
    tb = max(sub, (tb // sub) * sub)
    # TODO(synk): if C is so large that even tb==sub blows the VMEM budget, add
    # C as a trailing "arbitrary" grid axis with (tb,1) partial accumulators.

    b_pad = ((B + tb - 1) // tb) * tb
    num_tiles = b_pad // tb

    # Pad: logits with a huge negative (sigmoid -> 0), targets with 0, so the
    # padding contributes exactly 0 to intersection, union and the loss sum.
    logits = jnp.pad(outputs, ((0, b_pad - B), (0, c_pad - C)),
                     constant_values=-1e9)
    tgts = jnp.pad(targets, ((0, b_pad - B), (0, c_pad - C)),
                   constant_values=0)

    partials = pl.pallas_call(
        _soft_jaccard_kernel,
        out_shape=jax.ShapeDtypeStruct((num_tiles, 8, 128), jnp.float32),
        grid=(num_tiles,),
        in_specs=[
            pl.BlockSpec((tb, c_pad), lambda i: (i, 0)),
            pl.BlockSpec((tb, c_pad), lambda i: (i, 0)),
        ],
        out_specs=pl.BlockSpec((1, 8, 128), lambda i: (i, 0, 0)),
        compiler_params=pltpu.CompilerParams(
            dimension_semantics=("parallel",),
            vmem_limit_bytes=48 * 1024 * 1024,
        ),
    )(logits, tgts)

    # Each tile's partial loss-sum is replicated across its (8,128) block:
    # take one element per tile, sum, divide by the TRUE batch size.
    return jnp.sum(partials[:, 0, 0]) / B


def soft_jaccard_loss_ref(outputs, targets):
    eps = 1e-07
    o = jax.nn.sigmoid(outputs.astype(jnp.float32))
    t = targets.astype(jnp.float32)
    inter = jnp.sum(o * t, axis=1)
    union = jnp.sum(o + t - o * t, axis=1)
    return jnp.mean(1.0 - (inter + eps) / (union + eps))


if __name__ == "__main__":
    key = jax.random.PRNGKey(0)
    k1, k2, k3, k4 = jax.random.split(key, 4)

    # AWA2-style multi-label setup: 85 attribute classes.
    B, C = 8, 85
    logits = jax.random.normal(k1, (B, C), dtype=jnp.float32)
    labels = (jax.random.uniform(k2, (B, C)) > 0.5).astype(jnp.float32)

    loss = jax.block_until_ready(soft_jaccard_loss(logits, labels))
    ref = jax.block_until_ready(soft_jaccard_loss_ref(logits, labels))
    assert jnp.allclose(loss, ref, atol=1e-5, rtol=1e-5), (loss, ref)

    # Multi-tile path: batch not a multiple of the tile -> exercises batch
    # padding, lane padding, and the parallel per-tile partial outputs.
    B2 = 300
    logits2 = jax.random.normal(k3, (B2, C), dtype=jnp.float32)
    labels2 = (jax.random.uniform(k4, (B2, C)) > 0.5).astype(jnp.float32)
    loss2 = jax.block_until_ready(
        soft_jaccard_loss(logits2, labels2, block_rows=128))
    ref2 = jax.block_until_ready(soft_jaccard_loss_ref(logits2, labels2))
    assert jnp.allclose(loss2, ref2, atol=1e-5, rtol=1e-5), (loss2, ref2)

    print("KERNEL_OK")
</pallas_src>

<mosaic_0001>
module attributes {stable_mosaic.version = 11 : i64} {
  func.func @_soft_jaccard_kernel(%arg0: i32, %arg1: memref<8x128xf32, #tpu.memory_space<vmem>>, %arg2: memref<8x128xf32, #tpu.memory_space<vmem>>, %arg3: memref<1x8x128xf32, #tpu.memory_space<vmem>>) attributes {dimension_semantics = [#tpu.dimension_semantics<parallel>], iteration_bounds = array<i64: 1>, scalar_prefetch = 0 : i64, scratch_operands = 0 : i64, tpu.core_type = #tpu.core_type<tc>, window_params = [{transform_indices = @transform_0, window_bounds = array<i64: 8, 128>}, {transform_indices = @transform_1, window_bounds = array<i64: 8, 128>}, {transform_indices = @transform_2, window_bounds = array<i64: 1, 8, 128>}]} {
    %c0 = arith.constant 0 : index
    %c0_0 = arith.constant 0 : index
    %0 = vector.load %arg1[%c0, %c0_0] : memref<8x128xf32, #tpu.memory_space<vmem>>, vector<8x128xf32>
    %c0_1 = arith.constant 0 : index
    %c0_2 = arith.constant 0 : index
    %1 = vector.load %arg2[%c0_1, %c0_2] : memref<8x128xf32, #tpu.memory_space<vmem>>, vector<8x128xf32>
    %2 = arith.negf %0 : vector<8x128xf32>
    %3 = math.exp %2 : vector<8x128xf32>
    %cst = arith.constant 1.000000e+00 : f32
    %4 = vector.broadcast %cst : f32 to vector<8x128xf32>
    %5 = arith.addf %4, %3 : vector<8x128xf32>
    %6 = arith.divf %4, %5 : vector<8x128xf32>
    %7 = arith.mulf %6, %1 : vector<8x128xf32>
    %cst_3 = arith.constant dense<0.000000e+00> : vector<8xf32>
    %8 = vector.multi_reduction <add>, %7, %cst_3 [1] : vector<8x128xf32> to vector<8xf32>
    %9 = vector.shape_cast %8 : vector<8xf32> to vector<8x1xf32>
    %10 = arith.addf %6, %1 : vector<8x128xf32>
    %11 = arith.subf %10, %7 : vector<8x128xf32>
    %cst_4 = arith.constant dense<0.000000e+00> : vector<8xf32>
    %12 = vector.multi_reduction <add>, %11, %cst_4 [1] : vector<8x128xf32> to vector<8xf32>
    %13 = vector.shape_cast %12 : vector<8xf32> to vector<8x1xf32>
    %cst_5 = arith.constant 1.000000e-07 : f32
    %14 = vector.broadcast %cst_5 : f32 to vector<8x1xf32>
    %15 = arith.addf %9, %14 : vector<8x1xf32>
    %cst_6 = arith.constant 1.000000e-07 : f32
    %16 = vector.broadcast %cst_6 : f32 to vector<8x1xf32>
    %17 = arith.addf %13, %16 : vector<8x1xf32>
    %18 = arith.divf %15, %17 : vector<8x1xf32>
    %cst_7 = arith.constant 1.000000e+00 : f32
    %19 = vector.broadcast %cst_7 : f32 to vector<8x1xf32>
    %20 = arith.subf %19, %18 : vector<8x1xf32>
    %21 = vector.shape_cast %20 : vector<8x1xf32> to vector<1x8x1xf32>
    %cst_8 = arith.constant dense<0.000000e+00> : vector<1xf32>
    %22 = vector.multi_reduction <add>, %21, %cst_8 [1, 2] : vector<1x8x1xf32> to vector<1xf32>
    %23 = vector.shape_cast %22 : vector<1xf32> to vector<1x1x1xf32>
    %24 = vector.extract %23[0, 0, 0] : f32 from vector<1x1x1xf32>
    %25 = vector.broadcast %24 : f32 to vector<1x8x128xf32>
    %c0_9 = arith.constant 0 : index
    %c0_10 = arith.constant 0 : index
    %c0_11 = arith.constant 0 : index
    %26 = vector.load %arg3[%c0_9, %c0_10, %c0_11] : memref<1x8x128xf32, #tpu.memory_space<vmem>>, vector<1x8x128xf32>
    tpu.vector_store %arg3[%c0_9, %c0_10, %c0_11], %25 {strides = array<i32>} : memref<1x8x128xf32, #tpu.memory_space<vmem>>, vector<1x8x128xf32>,
    return
  }
  func.func @transform_0(%arg0: i32) -> (i32, i32) {
    %c0_i32 = arith.constant 0 : i32
    %c0_i32_0 = arith.constant 0 : i32
    return %arg0, %c0_i32 : i32, i32
  }
  func.func @transform_1(%arg0: i32) -> (i32, i32) {
    %c0_i32 = arith.constant 0 : i32
    %c0_i32_0 = arith.constant 0 : i32
    return %arg0, %c0_i32 : i32, i32
  }
  func.func @transform_2(%arg0: i32) -> (i32, i32, i32) {
    %c0_i32 = arith.constant 0 : i32
    %c0_i32_0 = arith.constant 0 : i32
    %c0_i32_1 = arith.constant 0 : i32
    return %arg0, %c0_i32, %c0_i32_0 : i32, i32, i32
  }
}

</mosaic_0001>

<bundles_post_ra>
// kernel: tpu_custom_call.1
= control target key start
LH: loop header
LB: loop body
LE: loop exit
PB: predicated region body
PF: predicated region fallthrough
CT: control target
= control target key end

     0   :  { %7 = vsyncpa [#allocation3], 0  ;;  %s190_s0 = inlined_call_operand.hbm [shape: f32[8,128], index: 0, kind: input, shape index: {}]   ;;  %s191_s1 = inlined_call_operand.hbm [shape: f32[8,128], index: 1, kind: input, shape index: {}]   ;;  %s192_s2 = inlined_call_operand.hbm [shape: f32[1,8,128], index: 2, kind: output, shape index: {}]  }
   0x1   :  { %8 = vsyncpa [#allocation6], 0 }
   0x2   :  { %9 = vsyncpa [#allocation4], 0  ;;  %s163_s9 = smov [#allocation2]   ;;  %s164_s11 = smov [#allocation5]  }
   0x3   :  { %s16_s10 = sshll.u32 %s163_s9, 4  ;;  %s26_s12 = sshll.u32 %s164_s11, 4  ;;  %s17_s10 = int_to_ptr.vmem [resolvable:$true] %s16_s10  ;;  %s27_s12 = int_to_ptr.vmem [resolvable:$true] %s26_s12 }
   0x4   :  { %s105_s13 = scalar_lea.vmem %s17_s10, 128  ;;  %p110_p1 = scmp.lt.s32.totalorder %s17_s10, %s17_s10 }
   0x5   :  { %p106_p0 = scmp.ne.s32.totalorder %s17_s10, %s105_s13  ;;  %p111_p2 = scmp.lt.s32.totalorder %s105_s13, %s105_s13 }
   0x7   :  { %p112_p3 = por %p111_p2, %p110_p1 }
   0x9   :  { %p113_p4 = pnand %p112_p3, %p106_p0 }
   0xb   :  { %116 = shalt.err (!%p113_p4)
}
   0xc   :  { %19 = dma.hbm_to_vmem [thread:$0]  %s190_s0, 128, %s17_s10, [#allocation3]  }
   0xd   :  { %s125_s16 = scalar_lea.vmem %s27_s12, 128  ;;  %p130_p6 = scmp.lt.s32.totalorder %s27_s12, %s27_s12 }
   0xe   :  { %p126_p5 = scmp.ne.s32.totalorder %s27_s12, %s125_s16  ;;  %p131_p7 = scmp.lt.s32.totalorder %s125_s16, %s125_s16 }
  0x10   :  { %p132_p8 = por %p131_p7, %p130_p6 }
  0x12   :  { %p133_p9 = pnand %p132_p8, %p126_p5 }
  0x14   :  { %136 = shalt.err (!%p133_p9)
}
  0x15   :  { %29 = dma.hbm_to_vmem [thread:$0]  %s191_s1, 128, %s27_s12, [#allocation6]  }
  0x16   :  { %157 = dma.done.wait [#allocation3], 128  }
  0x17   :  { %158 = vsyncadd [#allocation3], 4294967168 }
  0x18   :  { %159 = dma.done.wait [#allocation6], 128  }
  0x19   :  { %160 = vsyncadd [#allocation6], 4294967168  ;;  %v36_v0 = vld [vmem:[#allocation2] sm:$0xff]  ;;  %v37_v4 = vld [vmem:[#allocation5] sm:$0xff]  ;;  %vm56_vm0 = vcmask 7168   ;;  %s165_s0 = smov [#allocation7]  }
  0x1a   :  { %v85_v1 = vmul.f32 -1.442695, %v36_v0  ;;  %s75_s1 = sshll.u32 %s165_s0, 4  ;;  %s76_s1 = int_to_ptr.vmem [resolvable:$true] %s75_s1 }
  0x1b   :  { %s137_s20 = scalar_lea.vmem %s76_s1, 128  ;;  %p142_p11 = scmp.lt.s32.totalorder %s76_s1, %s76_s1 }
  0x1c   :  { %91 = vpow2.f32 %v85_v1  ;;  %p138_p10 = scmp.ne.s32.totalorder %s76_s1, %s137_s20  ;;  %p143_p12 = scmp.lt.s32.totalorder %s137_s20, %s137_s20 }
  0x1e   :  { %p144_p13 = por %p143_p12, %p142_p11 }
  0x20   :  { %p145_p0 = pnand %p144_p13, %p138_p10 }
  0x29   :  { %v92_v2 = vpop.eup %91 }
  0x2a   :  { %v41_v3 = vadd.f32 1.0, %v92_v2 }
  0x2c   :  { %93 = vrcp.f32 %v41_v3 }
  0x39   :  { %v94_v5 = vpop.eup %93 }
  0x3a   :  { %v44_v6 = vmul.f32 %v94_v5, %v37_v4  ;;  %v47_v7 = vadd.f32 %v94_v5, %v37_v4 }
  0x3c   :  { %v48_v8 = vsub.f32 %v47_v7, %v44_v6 }
  0x3e   :  { %49 = vadd.xlane.f32.xlu0 %v48_v8 }
  0x42   :  { %45 = vadd.xlane.f32.xlu0 %v44_v6 }
  0xc7   :  { %v50_v9 = vpop.xlane.xlu0 %49 }
  0xc8   :  { %v52_v10 = vadd.f32 1e-07, %v50_v9 }
  0xca   :  { %95 = vrcp.f32 %v52_v10 }
  0xcb   :  { %v46_v11 = vpop.xlane.xlu0 %45 }
  0xcc   :  { %v51_v12 = vadd.f32 1e-07, %v46_v11 }
  0xd7   :  { %v96_v13 = vpop.eup %95 }
  0xd8   :  { %v54_v14 = vmul.f32 %v96_v13, %v51_v12 }
  0xda   :  { %v55_v15 = vsub.f32 1.0, %v54_v14 }
  0xdc   :  { %v57_v16 = vsel %vm56_vm0, %v55_v15, 0.0 }
  0xdd   :  { %58 = vadd.xlane.f32.xlu1 %v57_v16 }
 0x166   :  { %v59_v17 = vpop.xlane.xlu1 %58 }
 0x167   :  { %v60_v18 = vrot.slane %v59_v17, 4 }
 0x169   :  { %v61_v19 = vadd.f32 %v60_v18, %v59_v17 }
 0x16b   :  { %v62_v20 = vrot.slane %v61_v19, 2 }
 0x16d   :  { %v63_v21 = vadd.f32 %v62_v20, %v61_v19 }
 0x16f   :  { %v64_v22 = vrot.slane %v63_v21, 1 }
 0x171   :  { %v65_v23 = vadd.f32 %v64_v22, %v63_v21 }
 0x173   :  { %86 = vpush %v65_v23 }
 0x1a4   :  { %s87_s19 = spop %86 }
 0x1a5   :  { %v67_v24 = vstv %s87_s19 }
 0x1a6   :  { %68 = vst [vmem:[#allocation7] sm:$0xff] %v67_v24 }
 0x1a7   :  { %148 = shalt.err (!%p145_p0)
}
 0x1a8   :  { %78 = dma.vmem_to_hbm [thread:$0]  %s76_s1, 128, %s192_s2, [#allocation4]  }
 0x1a9   :  { %161 = dma.done.wait [#allocation4], 128  }
 0x1aa   :  { %162 = vsyncadd [#allocation4], 4294967168 }
 0x1ab   :  { %82 = vsyncpa [#allocation3], 1 }
 0x1ac   :  { %83 = vsyncpa [#allocation6], 1 }
 0x1ad   :  { %84 = vsyncpa [#allocation4], 1 }

</bundles_post_ra>
